<compile_context>
chip_gen: v7x
topology: tpu7x:2x2x1
jax: 0.10.0
libtpu: 0.0.40
codegen_flags: <defaults>
</compile_context>

<pallas_src>
import functools

import jax
import jax.numpy as jnp
from jax.experimental import pallas as pl
from jax.experimental.pallas import tpu as pltpu

LANE = 128
SUBLANE = 8


def _round_up(x, m):
    return ((x + m - 1) // m) * m


def mlp_kernel(x_ref, w1_ref, b1_ref, w2_ref, b2_ref, o_ref):
    """One batch tile of: Linear -> Sigmoid -> Linear(width 1) -> Sigmoid."""
    x = x_ref[...]                                              # (TB, Dp) f32
    # Layer 1 on the MXU, f32 accumulation.
    h = jnp.dot(x, w1_ref[...], preferred_element_type=jnp.float32)
    h = jax.nn.sigmoid(h + b1_ref[...])                         # (TB, Hp)
    # Layer 2 (output width 1): VPU multiply + XLU lane reduction. Padded H
    # columns of h multiply zero entries of the padded W2 row -> exact sum.
    y = jnp.sum(h * w2_ref[...], axis=-1, keepdims=True)        # (TB, 1)
    y = jax.nn.sigmoid(y + b2_ref[0])                           # b2 scalar from SMEM
    # Lane-dense (unmasked) store: broadcast across 128 lanes; wrapper keeps col 0.
    o_ref[...] = jnp.broadcast_to(y, o_ref.shape).astype(o_ref.dtype)


@functools.partial(jax.jit, static_argnums=())
def base_model_forward(obs, w1p, b1p, w2p, b2):
    """obs: (B, 4*size*size) or (4*size*size,) float32 (unpadded).

    Params are already lane-padded (see pad_params / make_params).
    Returns (B, 1) float32 == sigmoid(sigmoid(obs @ W1 + b1) @ W2 + b2).
    """
    squeeze = obs.ndim == 1
    if squeeze:
        obs = obs[None, :]
    B, D = obs.shape
    Dp, Hp = w1p.shape

    # Batch tile: 512 rows for large rollout batches, else B rounded up to sublanes.
    tb = 512 if B >= 512 else _round_up(max(B, 1), SUBLANE)
    Bp = _round_up(B, tb)

    # Zero-pad obs to (Bp, Dp); extra rows/cols multiply zero weights / are sliced off.
    obs = obs.astype(jnp.float32)
    if (Bp, Dp) == (B, D):
        obs_p = obs
    else:
        obs_p = jnp.zeros((Bp, Dp), jnp.float32).at[:B, :D].set(obs)

    out = pl.pallas_call(
        mlp_kernel,
        out_shape=jax.ShapeDtypeStruct((Bp, LANE), jnp.float32),
        grid=(Bp // tb,),
        in_specs=[
            pl.BlockSpec((tb, Dp), lambda i: (i, 0)),            # batch-tiled activations
            pl.BlockSpec((Dp, Hp), lambda i: (0, 0)),            # VMEM-resident W1
            pl.BlockSpec((1, Hp), lambda i: (0, 0)),             # b1 row (lane-padded)
            pl.BlockSpec((1, Hp), lambda i: (0, 0)),             # W2 row (lane-padded)
            pl.BlockSpec(memory_space=pltpu.MemorySpace.SMEM),   # b2 scalar
        ],
        out_specs=pl.BlockSpec((tb, LANE), lambda i: (i, 0)),
        compiler_params=pltpu.CompilerParams(
            dimension_semantics=("parallel",)),
    )(obs_p, w1p, b1p, w2p, b2)

    y = out[:B, :1]
    return y[0] if squeeze else y


def make_params(size, hidden_units):
    """BaseModel.__init__ zero-initializes every parameter (nn.init.zeros_).

    Returns lane-padded kernel params:
      W1 (Dp, Hp)  -- PyTorch hidden.weight.T, zero-padded
      b1 (1, Hp)   -- hidden.bias, zero-padded
      W2 (1, Hp)   -- output.weight (already a row), zero-padded
      b2 (1,)      -- output.bias
    """
    d_in = 4 * size * size
    dp, hp = _round_up(d_in, LANE), _round_up(hidden_units, LANE)
    return (jnp.zeros((dp, hp), jnp.float32),
            jnp.zeros((1, hp), jnp.float32),
            jnp.zeros((1, hp), jnp.float32),
            jnp.zeros((1,), jnp.float32))


def pad_params(w1, b1, w2, b2):
    """Pad arbitrary (unpadded) params to the kernel layout.

    w1: (D_in, H) = torch hidden.weight.T, b1: (H,), w2: (H,) = torch
    output.weight row, b2: scalar.
    """
    d_in, h = w1.shape
    dp, hp = _round_up(d_in, LANE), _round_up(h, LANE)
    w1p = jnp.zeros((dp, hp), jnp.float32).at[:d_in, :h].set(w1.astype(jnp.float32))
    b1p = jnp.zeros((1, hp), jnp.float32).at[0, :h].set(b1.astype(jnp.float32))
    w2p = jnp.zeros((1, hp), jnp.float32).at[0, :h].set(w2.astype(jnp.float32))
    b2p = jnp.asarray(b2, jnp.float32).reshape((1,))
    return w1p, b1p, w2p, b2p


if __name__ == "__main__":
    # Small shapes consistent with the module: board size=4 -> D_in = 4*4*4 = 64,
    # hidden_units=32, batch=2.
    size, hidden_units, batch = 4, 32, 2
    d_in = 4 * size * size

    key = jax.random.PRNGKey(0)
    k_obs, k_w1, k_b1, k_w2, k_b2 = jax.random.split(key, 5)
    obs = jax.random.normal(k_obs, (batch, d_in), dtype=jnp.float32)

    # Random parameters to actually exercise the matmul / bias / sigmoid path
    # (zero-init params would make any layout bug invisible).
    w1 = 0.1 * jax.random.normal(k_w1, (d_in, hidden_units), dtype=jnp.float32)
    b1 = 0.1 * jax.random.normal(k_b1, (hidden_units,), dtype=jnp.float32)
    w2 = 0.1 * jax.random.normal(k_w2, (hidden_units,), dtype=jnp.float32)
    b2 = 0.1 * jax.random.normal(k_b2, (), dtype=jnp.float32)

    params = pad_params(w1, b1, w2, b2)
    out = jax.block_until_ready(base_model_forward(obs, *params))

    # Pure-JAX reference of BaseModel.forward (unpadded math).
    ref = jax.nn.sigmoid(jax.nn.sigmoid(obs @ w1 + b1) @ w2[:, None] + b2)
    assert out.shape == (batch, 1), out.shape
    assert jnp.allclose(out, ref, atol=1e-5, rtol=1e-5), (out, ref)

    # Single-observation path (how the self-play loop calls forward).
    out1 = jax.block_until_ready(base_model_forward(obs[0], *params))
    assert out1.shape == (1,), out1.shape
    assert jnp.allclose(out1, ref[0], atol=1e-5, rtol=1e-5), (out1, ref[0])

    # Module-faithful zero-initialized parameters: output must be sigmoid(0)=0.5.
    out0 = jax.block_until_ready(
        base_model_forward(obs, *make_params(size, hidden_units)))
    assert out0.shape == (batch, 1), out0.shape
    assert jnp.allclose(out0, 0.5, atol=1e-6), out0

    # TODO(synk): update_weights / eligibility traces / the self-play training
    # loop are host-side training logic, not part of the forward pass.
    print("KERNEL_OK")
</pallas_src>

<mosaic_0001>
module attributes {stable_mosaic.version = 11 : i64} {
  func.func @mlp_kernel(%arg0: i32, %arg1: memref<8x128xf32, #tpu.memory_space<vmem>>, %arg2: memref<128x128xf32, #tpu.memory_space<vmem>>, %arg3: memref<1x128xf32, #tpu.memory_space<vmem>>, %arg4: memref<1x128xf32, #tpu.memory_space<vmem>>, %arg5: memref<1xf32, #tpu.memory_space<smem>>, %arg6: memref<8x128xf32, #tpu.memory_space<vmem>>) attributes {dimension_semantics = [#tpu.dimension_semantics<parallel>], iteration_bounds = array<i64: 1>, scalar_prefetch = 0 : i64, scratch_operands = 0 : i64, tpu.core_type = #tpu.core_type<tc>, window_params = [{transform_indices = @transform_0, window_bounds = array<i64: 8, 128>}, {pipeline_mode = #tpu.pipeline_mode<synchronous>, transform_indices = @transform_1, window_bounds = array<i64: 128, 128>}, {pipeline_mode = #tpu.pipeline_mode<synchronous>, transform_indices = @transform_2, window_bounds = array<i64: 1, 128>}, {pipeline_mode = #tpu.pipeline_mode<synchronous>, transform_indices = @transform_3, window_bounds = array<i64: 1, 128>}, {transform_indices = @transform_4, window_bounds = array<i64: 1>}, {transform_indices = @transform_5, window_bounds = array<i64: 8, 128>}]} {
    %c0 = arith.constant 0 : index
    %c0_0 = arith.constant 0 : index
    %0 = vector.load %arg1[%c0, %c0_0] : memref<8x128xf32, #tpu.memory_space<vmem>>, vector<8x128xf32>
    %c0_1 = arith.constant 0 : index
    %c0_2 = arith.constant 0 : index
    %1 = vector.load %arg2[%c0_1, %c0_2] : memref<128x128xf32, #tpu.memory_space<vmem>>, vector<128x128xf32>
    %cst = arith.constant dense<0.000000e+00> : vector<8x128xf32>
    %2 = tpu.matmul %0, %1, %cst {dimension_numbers = #tpu.dot_dimension_numbers<[1], [0], [0], [1], [0, 0, 1, 1], [], []>} : vector<8x128xf32>, vector<128x128xf32>, vector<8x128xf32> -> vector<8x128xf32>
    %c0_3 = arith.constant 0 : index
    %c0_4 = arith.constant 0 : index
    %3 = vector.load %arg3[%c0_3, %c0_4] : memref<1x128xf32, #tpu.memory_space<vmem>>, vector<1x128xf32>
    %4 = vector.broadcast %3 : vector<1x128xf32> to vector<8x128xf32>
    %5 = arith.addf %2, %4 : vector<8x128xf32>
    %6 = arith.negf %5 : vector<8x128xf32>
    %7 = math.exp %6 : vector<8x128xf32>
    %cst_5 = arith.constant 1.000000e+00 : f32
    %8 = vector.broadcast %cst_5 : f32 to vector<8x128xf32>
    %9 = arith.addf %8, %7 : vector<8x128xf32>
    %10 = arith.divf %8, %9 : vector<8x128xf32>
    %c0_6 = arith.constant 0 : index
    %c0_7 = arith.constant 0 : index
    %11 = vector.load %arg4[%c0_6, %c0_7] : memref<1x128xf32, #tpu.memory_space<vmem>>, vector<1x128xf32>
    %12 = vector.broadcast %11 : vector<1x128xf32> to vector<8x128xf32>
    %13 = arith.mulf %10, %12 : vector<8x128xf32>
    %cst_8 = arith.constant dense<0.000000e+00> : vector<8xf32>
    %14 = vector.multi_reduction <add>, %13, %cst_8 [1] : vector<8x128xf32> to vector<8xf32>
    %15 = vector.shape_cast %14 : vector<8xf32> to vector<8x1xf32>
    %c0_9 = arith.constant 0 : index
    %16 = memref.load %arg5[%c0_9] : memref<1xf32, #tpu.memory_space<smem>>
    %17 = vector.broadcast %16 : f32 to vector<8x1xf32>
    %18 = arith.addf %15, %17 : vector<8x1xf32>
    %19 = arith.negf %18 : vector<8x1xf32>
    %20 = math.exp %19 : vector<8x1xf32>
    %cst_10 = arith.constant 1.000000e+00 : f32
    %21 = vector.broadcast %cst_10 : f32 to vector<8x1xf32>
    %22 = arith.addf %21, %20 : vector<8x1xf32>
    %23 = arith.divf %21, %22 : vector<8x1xf32>
    %24 = vector.shape_cast %23 : vector<8x1xf32> to vector<8x1xf32>
    %25 = vector.broadcast %24 : vector<8x1xf32> to vector<8x128xf32>
    %c0_11 = arith.constant 0 : index
    %c0_12 = arith.constant 0 : index
    %26 = vector.load %arg6[%c0_11, %c0_12] : memref<8x128xf32, #tpu.memory_space<vmem>>, vector<8x128xf32>
    tpu.vector_store %arg6[%c0_11, %c0_12], %25 {strides = array<i32>} : memref<8x128xf32, #tpu.memory_space<vmem>>, vector<8x128xf32>,
    return
  }
  func.func @transform_0(%arg0: i32) -> (i32, i32) {
    %c0_i32 = arith.constant 0 : i32
    %c0_i32_0 = arith.constant 0 : i32
    return %arg0, %c0_i32 : i32, i32
  }
  func.func @transform_1(%arg0: i32) -> (i32, i32) {
    %c0_i32 = arith.constant 0 : i32
    %c0_i32_0 = arith.constant 0 : i32
    %c0_i32_1 = arith.constant 0 : i32
    return %c0_i32, %c0_i32_0 : i32, i32
  }
  func.func @transform_2(%arg0: i32) -> (i32, i32) {
    %c0_i32 = arith.constant 0 : i32
    %c0_i32_0 = arith.constant 0 : i32
    %c0_i32_1 = arith.constant 0 : i32
    return %c0_i32, %c0_i32_0 : i32, i32
  }
  func.func @transform_3(%arg0: i32) -> (i32, i32) {
    %c0_i32 = arith.constant 0 : i32
    %c0_i32_0 = arith.constant 0 : i32
    %c0_i32_1 = arith.constant 0 : i32
    return %c0_i32, %c0_i32_0 : i32, i32
  }
  func.func @transform_4(%arg0: i32) -> i32 {
    %c0_i32 = arith.constant 0 : i32
    %c0_i32_0 = arith.constant 0 : i32
    return %c0_i32 : i32
  }
  func.func @transform_5(%arg0: i32) -> (i32, i32) {
    %c0_i32 = arith.constant 0 : i32
    %c0_i32_0 = arith.constant 0 : i32
    return %arg0, %c0_i32 : i32, i32
  }
}

</mosaic_0001>

<bundles_post_ra>
// kernel: base_model_forward.1
= control target key start
LH: loop header
LB: loop body
LE: loop exit
PB: predicated region body
PF: predicated region fallthrough
CT: control target
= control target key end

     0   :  { %11 = vsyncpa [#allocation4], 0  ;;  %s278_s18 = smov [#allocation3]   ;;  %s341_s0 = inlined_call_operand.vmem [shape: f32[8,128], index: 0, kind: input, shape index: {}]   ;;  %s342_s1 = inlined_call_operand.hbm [shape: f32[128,128], index: 1, kind: input, shape index: {}]   ;;  %s343_s2 = inlined_call_operand.vmem [shape: f32[1,128], index: 2, kind: input, shape index: {}]   ;;  %s344_s3 = inlined_call_operand.vmem [shape: f32[1,128], index: 3, kind: input, shape index: {}]   ;;  %s345_s4 = inlined_call_operand.<no memory space> [shape: f32[1], index: 4, kind: input, shape index: {}]   ;;  %s346_s5 = inlined_call_operand.vmem [shape: f32[8,128], index: 5, kind: output, shape index: {}]  }
   0x1   :  { %s19_s19 = sshll.u32 %s278_s18, 4  ;;  %s254_s22 = scalar_lea.hbm %s342_s1, 2048  ;;  %s20_s19 = int_to_ptr.vmem [resolvable:$true] %s19_s19 }
   0x2   :  { %p255_p0 = scmp.ne.s32.totalorder %s342_s1, %s254_s22  ;;  %p258_p1 = scmp.lt.u32.totalorder %s254_s22, %s342_s1 }
   0x4   :  { %p260_p2 = pnand %p258_p1, %p255_p0 }
   0x6   :  { %263 = shalt.err (!%p260_p2)
}
   0x7   :  { %s264_s27 = scalar_lea.vmem %s20_s19, 2048  ;;  %p269_p4 = scmp.lt.s32.totalorder %s20_s19, %s20_s19 }
   0x8   :  { %p265_p3 = scmp.ne.s32.totalorder %s20_s19, %s264_s27  ;;  %p270_p5 = scmp.lt.s32.totalorder %s264_s27, %s264_s27 }
   0xa   :  { %p271_p6 = por %p270_p5, %p269_p4 }
   0xc   :  { %p272_p7 = pnand %p271_p6, %p265_p3 }
   0xe   :  { %275 = shalt.err (!%p272_p7)
}
   0xf   :  { %s279_s28 = smov 128   ;;  %s280_s29 = smov 8  }
  0x10   :  { %25 = dma.hbm_to_vmem [thread:$0]  %s342_s1, 2048, %s20_s19, [#allocation4], %s279_s28, %s279_s28, %s280_s29  }
  0x11   :  { %276 = dma.done.wait [#allocation4], 2048  }
  0x12   :  { %277 = vsyncadd [#allocation4], 4294965248  ;;  %v281_v0 = vmov 0.0|0.0   ;;  %vm282_vm0 = vmmov 0   ;;  %v283_v1 = vmov 0.0   ;;  %v36_v2 = vld [vmem:[#allocation3] sm:$0xff]  ;;  %v146_v37 = vstv %s345_s4 }
  0x13   :  { %216 = vmatprep.subr.bf16.mxu0 %v281_v0  ;;  %213 = vmatprep.mubr.msk.f32.mxu0 %vm282_vm0, %v283_v1  ;;  %v37_v3 = vld [vmem:[#allocation3 + $0x8] sm:$0xff]  ;;  %v38_v4 = vld [vmem:[#allocation3 + $0x10] sm:$0xff]  ;;  %v39_v6 = vld [vmem:[#allocation3 + $0x18] sm:$0xff] }
  0x14   :  { %v217_v5 = vpack.c.bf16 %v37_v3, %v36_v2  ;;  %v220_v7 = vpack.c.bf16 %v39_v6, %v38_v4  ;;  %v40_v8 = vld [vmem:[#allocation3 + $0x20] sm:$0xff]  ;;  %v41_v9 = vld [vmem:[#allocation3 + $0x28] sm:$0xff]  ;;  %v42_v11 = vld [vmem:[#allocation3 + $0x30] sm:$0xff] }
  0x15   :  { %v223_v10 = vpack.c.bf16 %v41_v9, %v40_v8  ;;  %v43_v12 = vld [vmem:[#allocation3 + $0x38] sm:$0xff]  ;;  %v44_v14 = vld [vmem:[#allocation3 + $0x40] sm:$0xff]  ;;  %v45_v15 = vld [vmem:[#allocation3 + $0x48] sm:$0xff] }
  0x16   :  { %218 = vmatpush3.bf16.msra.mxu0 %v217_v5  ;;  %v226_v13 = vpack.c.bf16 %v43_v12, %v42_v11  ;;  %v229_v16 = vpack.c.bf16 %v45_v15, %v44_v14  ;;  %v46_v17 = vld [vmem:[#allocation3 + $0x50] sm:$0xff]  ;;  %v47_v18 = vld [vmem:[#allocation3 + $0x58] sm:$0xff]  ;;  %v48_v20 = vld [vmem:[#allocation3 + $0x60] sm:$0xff] }
  0x17   :  { %219 = vmatprep.subr.bf16.mxu0 %v281_v0  ;;  %v232_v19 = vpack.c.bf16 %v47_v18, %v46_v17  ;;  %v49_v21 = vld [vmem:[#allocation3 + $0x68] sm:$0xff]  ;;  %v50_v23 = vld [vmem:[#allocation3 + $0x70] sm:$0xff]  ;;  %v51_v24 = vld [vmem:[#allocation3 + $0x78] sm:$0xff] }
  0x18   :  { %v235_v22 = vpack.c.bf16 %v49_v21, %v48_v20  ;;  %v238_v25 = vpack.c.bf16 %v51_v24, %v50_v23  ;;  %v35_v26 = vld [vmem:[%s341_s0] sm:$0xff] }
  0x19   :  { %v160_v27 = vld [vmem:[%s343_s2] ss:$0 sm:$0xff] }
  0x1a   :  { %221 = vmatpush3.bf16.msra.mxu0 %v220_v7  ;;  %v162_v34 = vld [vmem:[%s344_s3] ss:$0 sm:$0xff] }
  0x1b   :  { %222 = vmatprep.subr.bf16.mxu0 %v281_v0 }
  0x1e   :  { %224 = vmatpush3.bf16.msra.mxu0 %v223_v10 }
  0x1f   :  { %225 = vmatprep.subr.bf16.mxu0 %v281_v0 }
  0x22   :  { %227 = vmatpush3.bf16.msra.mxu0 %v226_v13 }
  0x23   :  { %228 = vmatprep.subr.bf16.mxu0 %v281_v0 }
  0x26   :  { %230 = vmatpush3.bf16.msra.mxu0 %v229_v16 }
  0x27   :  { %231 = vmatprep.subr.bf16.mxu0 %v281_v0 }
  0x2a   :  { %233 = vmatpush3.bf16.msra.mxu0 %v232_v19 }
  0x2b   :  { %234 = vmatprep.subr.bf16.mxu0 %v281_v0 }
  0x2e   :  { %236 = vmatpush3.bf16.msra.mxu0 %v235_v22 }
  0x2f   :  { %237 = vmatprep.subr.bf16.mxu0 %v281_v0 }
  0x32   :  { %239 = vmatpush3.bf16.msra.mxu0 %v238_v25 }
  0x35   :  { %214 = vmatmul.mubr.f32.vlgmr.msra.gmra.mrb[0].mxu0 %v35_v26 }
 0x108   :  { %v125_v28 = vpop.f32.mrb[0].mxu0 }
 0x109   :  { %v126_v29 = vadd.f32 %v160_v27, %v125_v28  ;;  %v215_v30 = vpop.f32.mrb[1].mxu0 }
 0x10b   :  { %v161_v31 = vmul.f32 -1.442695, %v126_v29 }
 0x10d   :  { %246 = vpow2.f32 %v161_v31 }
 0x117   :  { %v247_v32 = vpop.eup %246 }
 0x118   :  { %v132_v33 = vadd.f32 1.0, %v247_v32 }
 0x11a   :  { %248 = vrcp.f32 %v132_v33 }
 0x124   :  { %v249_v35 = vpop.eup %248 }
 0x125   :  { %v142_v36 = vmul.f32 %v249_v35, %v162_v34 }
 0x127   :  { %143 = vadd.xlane.f32.xlu0 %v142_v36 }
 0x1b4   :  { %v144_v38 = vpop.xlane.xlu0 %143 }
 0x1b5   :  { %v147_v39 = vadd.f32 %v146_v37, %v144_v38 }
 0x1b7   :  { %v163_v40 = vmul.f32 -1.442695, %v147_v39 }
 0x1b9   :  { %250 = vpow2.f32 %v163_v40 }
 0x1c3   :  { %v251_v41 = vpop.eup %250 }
 0x1c4   :  { %v151_v42 = vadd.f32 1.0, %v251_v41 }
 0x1c6   :  { %252 = vrcp.f32 %v151_v42 }
 0x1d0   :  { %v253_v43 = vpop.eup %252 }
 0x1d1   :  { %154 = vst [vmem:[%s346_s5] sm:$0xff] %v253_v43 }
 0x1d2   :  { %159 = vsyncpa [#allocation4], 1 }

</bundles_post_ra>
